<compile_context>
chip_gen: v7x
topology: tpu7x:2x2x1
jax: 0.10.0
libtpu: 0.0.40
codegen_flags: <defaults>
</compile_context>

<pallas_src>
import functools

import jax
import jax.numpy as jnp
from jax import lax
from jax.experimental import pallas as pl
from jax.experimental.pallas import tpu as pltpu


def _pick_time_tile(T, lane_elems, itemsize, override=None):
    """Pick a time tile (multiple of 8, ~<=2 MiB per input block) and grid length."""
    if override is not None:
        cap = int(override)
    else:
        target_bytes = 2 * 1024 * 1024          # per-block budget per operand
        cap = target_bytes // max(1, lane_elems * itemsize)
    cap = max(8, min(2048, (cap // 8) * 8))
    if T <= cap:
        return T, 1                              # single full block (always legal)
    return cap, pl.cdiv(T, cap)                  # fixed tile; tail masked in-kernel


def _l1_tile_partial_kernel(x_ref, t_ref, o_ref, *, total_rows, needs_mask):
    """One time tile: o[ti, :] = sum over valid rows of |x - t| (per lane)."""
    x = x_ref[...].astype(jnp.float32)           # (TT, N*2); upcast in-kernel (VPU)
    t = t_ref[...].astype(jnp.float32)
    diff = jnp.abs(x - t)
    if needs_mask:
        tile_rows = x_ref.shape[0]
        row = lax.broadcasted_iota(jnp.int32, diff.shape, 0)
        remaining = total_rows - pl.program_id(0) * tile_rows
        diff = jnp.where(row < remaining, diff, 0.0)
    o_ref[...] = jnp.sum(diff, axis=0, keepdims=True)   # (1, N*2) per-tile partial


def l1_loss(inputs, targets, batch_split, keep_batch_dim=False, *, time_tile=None):
    """Pallas equivalent of L1Loss.forward.

    inputs:      (T, N, D) with D >= 2 (only the first two coords are penalized)
    targets:     (T, N, 2)
    batch_split: (B + 1,) int indices; batch_split[:-1] are the primary columns.
    """
    T, N, D = inputs.shape
    Tt, Nt, C = targets.shape
    assert (Tt, Nt) == (T, N) and C == 2 and D >= 2
    B = batch_split.shape[0] - 1

    # Drop unused feature lanes before the kernel, then flatten to lane-dense rows
    # (free, row-major).  After the slice, inputs/targets share one lane layout.
    x2 = inputs if D == 2 else inputs[..., :2]
    NL = N * 2
    xf = x2.reshape(T, NL)
    tf = targets.reshape(T, NL)

    itemsize = max(xf.dtype.itemsize, tf.dtype.itemsize)
    TT, n_t = _pick_time_tile(T, NL, itemsize, override=time_tile)

    kernel = functools.partial(
        _l1_tile_partial_kernel, total_rows=T, needs_mask=(T % TT != 0))

    cost = pl.CostEstimate(
        flops=3 * T * NL,                        # sub + abs + accumulate
        transcendentals=0,
        bytes_accessed=T * NL * (xf.dtype.itemsize + tf.dtype.itemsize)
        + n_t * NL * 4,
    )

    partials = pl.pallas_call(
        kernel,
        out_shape=jax.ShapeDtypeStruct((n_t, NL), jnp.float32),
        grid=(n_t,),
        in_specs=[pl.BlockSpec((TT, NL), lambda ti: (ti, 0)),
                  pl.BlockSpec((TT, NL), lambda ti: (ti, 0))],
        out_specs=pl.BlockSpec((1, NL), lambda ti: (ti, 0)),
        compiler_params=pltpu.CompilerParams(
            dimension_semantics=("parallel",)),  # independent tiles -> megacore OK
        cost_estimate=cost,
    )(xf, tf)

    # Tiny epilogue on (n_t, N*2) floats: pick primary columns, finish the means.
    lane_sums = jnp.sum(partials, axis=0)        # (N*2,)  sum over time tiles
    per_ped = lane_sums.reshape(N, 2)            # (N, 2)  sum_t |x - t|
    prim = batch_split[:-1]
    per_primary = per_ped[prim].sum(axis=-1)     # (B,)    sum_t sum_c |x - t|
    if keep_batch_dim:
        return per_primary / (T * 2)             # == loss.mean(0).mean(1)
    return per_primary.sum() / (B * T * 2)       # == loss.mean()


def _reference(inputs, targets, batch_split, keep_batch_dim=False):
    prim = batch_split[:-1]
    x = inputs[:, prim, :2].astype(jnp.float32)
    t = targets[:, prim, :].astype(jnp.float32)
    loss = jnp.abs(x - t)
    if keep_batch_dim:
        return jnp.mean(loss, axis=0).mean(axis=-1)
    return jnp.mean(loss)


if __name__ == "__main__":
    key = jax.random.PRNGKey(0)
    k1, k2, k3, k4 = jax.random.split(key, 4)

    # seq_len T=8, num_peds N=12, feature dim D=5 (e.g. bivariate gaussian params)
    T, N, D = 8, 12, 5
    inputs = jax.random.normal(k1, (T, N, D), dtype=jnp.float32)
    targets = jax.random.normal(k2, (T, N, 2), dtype=jnp.float32)
    # Scenes split at [0, 4, 9, 12]: primaries are pedestrians 0, 4, 9 (B=3).
    batch_split = jnp.array([0, 4, 9, 12], dtype=jnp.int32)

    # Default path: scalar mean loss.
    loss = jax.block_until_ready(l1_loss(inputs, targets, batch_split))
    ref = _reference(inputs, targets, batch_split)
    assert jnp.allclose(loss, ref, rtol=1e-5, atol=1e-5), (loss, ref)

    # keep_batch_dim=True path: per-primary loss.
    loss_b = jax.block_until_ready(
        l1_loss(inputs, targets, batch_split, keep_batch_dim=True))
    ref_b = _reference(inputs, targets, batch_split, keep_batch_dim=True)
    assert loss_b.shape == ref_b.shape
    assert jnp.allclose(loss_b, ref_b, rtol=1e-5, atol=1e-5), (loss_b, ref_b)

    # bf16 activations: only bf16 bytes cross HBM; in-kernel upcast is exact.
    loss_bf = jax.block_until_ready(
        l1_loss(inputs.astype(jnp.bfloat16), targets.astype(jnp.bfloat16),
                batch_split))
    ref_bf = _reference(inputs.astype(jnp.bfloat16), targets.astype(jnp.bfloat16),
                        batch_split)
    assert jnp.allclose(loss_bf, ref_bf, rtol=1e-5, atol=1e-5), (loss_bf, ref_bf)

    # Masked-tail / multi-tile path: T not divisible by the time tile.
    T2 = 200
    inputs2 = jax.random.normal(k3, (T2, N, D), dtype=jnp.float32)
    targets2 = jax.random.normal(k4, (T2, N, 2), dtype=jnp.float32)
    loss2 = jax.block_until_ready(
        l1_loss(inputs2, targets2, batch_split, time_tile=64))      # grid=(4,), tail=8
    ref2 = _reference(inputs2, targets2, batch_split)
    assert jnp.allclose(loss2, ref2, rtol=1e-5, atol=1e-5), (loss2, ref2)
    loss2_b = jax.block_until_ready(
        l1_loss(inputs2, targets2, batch_split, keep_batch_dim=True, time_tile=64))
    ref2_b = _reference(inputs2, targets2, batch_split, keep_batch_dim=True)
    assert jnp.allclose(loss2_b, ref2_b, rtol=1e-5, atol=1e-5), (loss2_b, ref2_b)

    print("KERNEL_OK")
</pallas_src>

<mosaic_0001>
module attributes {stable_mosaic.version = 11 : i64} {
  func.func @_l1_tile_partial_kernel(%arg0: i32, %arg1: memref<8x24xf32, #tpu.memory_space<vmem>>, %arg2: memref<8x24xf32, #tpu.memory_space<vmem>>, %arg3: memref<1x24xf32, #tpu.memory_space<vmem>>) attributes {dimension_semantics = [#tpu.dimension_semantics<parallel>], iteration_bounds = array<i64: 1>, scalar_prefetch = 0 : i64, scratch_operands = 0 : i64, tpu.core_type = #tpu.core_type<tc>, window_params = [{transform_indices = @transform_0, window_bounds = array<i64: 8, 24>}, {transform_indices = @transform_1, window_bounds = array<i64: 8, 24>}, {transform_indices = @transform_2, window_bounds = array<i64: 1, 24>}]} {
    %c0 = arith.constant 0 : index
    %c0_0 = arith.constant 0 : index
    %0 = vector.load %arg1[%c0, %c0_0] : memref<8x24xf32, #tpu.memory_space<vmem>>, vector<8x24xf32>
    %c0_1 = arith.constant 0 : index
    %c0_2 = arith.constant 0 : index
    %1 = vector.load %arg2[%c0_1, %c0_2] : memref<8x24xf32, #tpu.memory_space<vmem>>, vector<8x24xf32>
    %2 = arith.subf %0, %1 : vector<8x24xf32>
    %3 = math.absf %2 : vector<8x24xf32>
    %cst = arith.constant dense<0.000000e+00> : vector<24xf32>
    %4 = vector.multi_reduction <add>, %3, %cst [0] : vector<8x24xf32> to vector<24xf32>
    %5 = vector.shape_cast %4 : vector<24xf32> to vector<1x24xf32>
    %c0_3 = arith.constant 0 : index
    %c0_4 = arith.constant 0 : index
    %6 = vector.load %arg3[%c0_3, %c0_4] : memref<1x24xf32, #tpu.memory_space<vmem>>, vector<1x24xf32>
    tpu.vector_store %arg3[%c0_3, %c0_4], %5 {strides = array<i32>} : memref<1x24xf32, #tpu.memory_space<vmem>>, vector<1x24xf32>,
    return
  }
  func.func @transform_0(%arg0: i32) -> (i32, i32) {
    %c0_i32 = arith.constant 0 : i32
    %c0_i32_0 = arith.constant 0 : i32
    return %arg0, %c0_i32 : i32, i32
  }
  func.func @transform_1(%arg0: i32) -> (i32, i32) {
    %c0_i32 = arith.constant 0 : i32
    %c0_i32_0 = arith.constant 0 : i32
    return %arg0, %c0_i32 : i32, i32
  }
  func.func @transform_2(%arg0: i32) -> (i32, i32) {
    %c0_i32 = arith.constant 0 : i32
    %c0_i32_0 = arith.constant 0 : i32
    return %arg0, %c0_i32 : i32, i32
  }
}

</mosaic_0001>

<bundles_post_ra>
// kernel: tpu_custom_call.1
= control target key start
LH: loop header
LB: loop body
LE: loop exit
PB: predicated region body
PF: predicated region fallthrough
CT: control target
= control target key end

     0   :  { %7 = vsyncpa [#allocation3], 0  ;;  %s195_s0 = inlined_call_operand.hbm [shape: f32[8,24], index: 0, kind: input, shape index: {}]   ;;  %s196_s1 = inlined_call_operand.hbm [shape: f32[8,24], index: 1, kind: input, shape index: {}]   ;;  %s197_s2 = inlined_call_operand.hbm [shape: f32[1,24], index: 2, kind: output, shape index: {}]  }
   0x1   :  { %8 = vsyncpa [#allocation6], 0 }
   0x2   :  { %9 = vsyncpa [#allocation4], 0  ;;  %s141_s9 = smov [#allocation2]   ;;  %s142_s11 = smov [#allocation5]  }
   0x3   :  { %s16_s10 = sshll.u32 %s141_s9, 4  ;;  %s26_s12 = sshll.u32 %s142_s11, 4  ;;  %s17_s10 = int_to_ptr.vmem [resolvable:$true] %s16_s10  ;;  %s27_s12 = int_to_ptr.vmem [resolvable:$true] %s26_s12 }
   0x4   :  { %s69_s15 = scalar_lea.hbm %s195_s0, 128 }
   0x5   :  { %p70_p0 = scmp.ne.s32.totalorder %s195_s0, %s69_s15  ;;  %p73_p1 = scmp.lt.u32.totalorder %s69_s15, %s195_s0 }
   0x7   :  { %p75_p2 = pnand %p73_p1, %p70_p0 }
   0x9   :  { %78 = shalt.err (!%p75_p2)
}
   0xa   :  { %s79_s20 = scalar_lea.vmem %s17_s10, 128  ;;  %p84_p4 = scmp.lt.s32.totalorder %s17_s10, %s17_s10 }
   0xb   :  { %p80_p3 = scmp.ne.s32.totalorder %s17_s10, %s79_s20  ;;  %p85_p5 = scmp.lt.s32.totalorder %s79_s20, %s79_s20 }
   0xd   :  { %p86_p6 = por %p85_p5, %p84_p4 }
   0xf   :  { %p87_p7 = pnand %p86_p6, %p80_p3 }
  0x11   :  { %90 = shalt.err (!%p87_p7)
}
  0x12   :  { %19 = dma.hbm_to_vmem [thread:$0]  %s195_s0, 128, %s17_s10, [#allocation3]  }
  0x13   :  { %s91_s25 = scalar_lea.hbm %s196_s1, 128 }
  0x14   :  { %p92_p8 = scmp.ne.s32.totalorder %s196_s1, %s91_s25  ;;  %p95_p9 = scmp.lt.u32.totalorder %s91_s25, %s196_s1 }
  0x16   :  { %p97_p10 = pnand %p95_p9, %p92_p8 }
  0x18   :  { %100 = shalt.err (!%p97_p10)
}
  0x19   :  { %s101_s30 = scalar_lea.vmem %s27_s12, 128  ;;  %p106_p12 = scmp.lt.s32.totalorder %s27_s12, %s27_s12 }
  0x1a   :  { %p102_p11 = scmp.ne.s32.totalorder %s27_s12, %s101_s30  ;;  %p107_p13 = scmp.lt.s32.totalorder %s101_s30, %s101_s30 }
  0x1c   :  { %p108_p0 = por %p107_p13, %p106_p12 }
  0x1e   :  { %p109_p1 = pnand %p108_p0, %p102_p11 }
  0x20   :  { %112 = shalt.err (!%p109_p1)
}
  0x21   :  { %29 = dma.hbm_to_vmem [thread:$0]  %s196_s1, 128, %s27_s12, [#allocation6]  }
  0x22   :  { %135 = dma.done.wait [#allocation3], 128  }
  0x23   :  { %136 = vsyncadd [#allocation3], 4294967168 }
  0x24   :  { %137 = dma.done.wait [#allocation6], 128  }
  0x25   :  { %138 = vsyncadd [#allocation6], 4294967168  ;;  %v36_v0 = vld [vmem:[#allocation2] sm:$0xff]  ;;  %v37_v1 = vld [vmem:[#allocation5] sm:$0xff]  ;;  %vm40_vm0 = vcmask 195584   ;;  %s143_s4 = smov [#allocation7]  }
  0x26   :  { %v38_v2 = vsub.f32 %v36_v0, %v37_v1  ;;  %s56_s5 = sshll.u32 %s143_s4, 4  ;;  %vm48_vm1 = vcmask 188416   ;;  %s57_s5 = int_to_ptr.vmem [resolvable:$true] %s56_s5 }
  0x27   :  { %s113_s1 = scalar_lea.vmem %s57_s5, 16  ;;  %s117_s6 = scalar_lea.vmem %s57_s5, 32 }
  0x28   :  { %v39_v3 = vand.u32 2147483647, %v38_v2  ;;  %p114_p2 = scmp.ne.s32.totalorder %s57_s5, %s113_s1  ;;  %p118_p3 = scmp.lt.s32.totalorder %s57_s5, %s57_s5 }
  0x29   :  { %p119_p4 = scmp.lt.s32.totalorder %s117_s6, %s113_s1 }
  0x2a   :  { %v41_v4 = vsel %vm40_vm0, %v39_v3, 0.0 }
  0x2b   :  { %v42_v5 = vrot.slane %v41_v4, 4  ;;  %p120_p5 = por %p119_p4, %p118_p3 }
  0x2d   :  { %v43_v6 = vadd.f32 %v42_v5, %v41_v4  ;;  %p121_p6 = pnand %p120_p5, %p114_p2 }
  0x2f   :  { %v44_v7 = vrot.slane %v43_v6, 2 }
  0x31   :  { %v45_v8 = vadd.f32 %v44_v7, %v43_v6 }
  0x33   :  { %v46_v9 = vrot.slane %v45_v8, 1 }
  0x35   :  { %v47_v10 = vadd.f32 %v46_v9, %v45_v8 }
  0x37   :  { %49 = vst.msk [vmem:[#allocation7] sm:$0x1] %vm48_vm1, %v47_v10 }
  0x38   :  { %124 = shalt.err (!%p121_p6)
}
  0x39   :  { %s125_s9 = scalar_lea.hbm %s197_s2, 16 }
  0x3a   :  { %p126_p7 = scmp.ne.s32.totalorder %s197_s2, %s125_s9  ;;  %p129_p8 = scmp.lt.u32.totalorder %s125_s9, %s197_s2 }
  0x3c   :  { %p131_p9 = pnand %p129_p8, %p126_p7 }
  0x3e   :  { %134 = shalt.err (!%p131_p9)
}
  0x3f   :  { %59 = dma.vmem_to_hbm [thread:$0]  %s57_s5, 16, %s197_s2, [#allocation4]  }
  0x40   :  { %139 = dma.done.wait [#allocation4], 16  }
  0x41   :  { %140 = vsyncadd [#allocation4], 4294967280 }
  0x42   :  { %63 = vsyncpa [#allocation3], 1 }
  0x43   :  { %64 = vsyncpa [#allocation6], 1 }
  0x44   :  { %65 = vsyncpa [#allocation4], 1 }

</bundles_post_ra>
